<compile_context>
chip_gen: v7x
topology: tpu7x:2x2x1
jax: 0.10.0
libtpu: 0.0.40
codegen_flags: <defaults>
</compile_context>

<pallas_src>
import functools

import jax
import jax.numpy as jnp
import numpy as np
from jax.experimental import pallas as pl
from jax.experimental.pallas import tpu as pltpu


def _round_up(x, m):
    return ((x + m - 1) // m) * m


def _outconv_kernel(x_ref, w_ref, b_ref, o_ref, *, n_batch):
    # x_ref: (N, Cin, St)   input slab (channels on sublanes, spatial on lanes)
    # w_ref: (Cout, Cin)    1x1x1 conv weight (resident in VMEM across steps)
    # b_ref: (Cout, 1)      bias, f32 (broadcast across the lane-dense dim)
    # o_ref: (N, Cout, St)  output slab (St % 128 == 0 -> unmasked stores)
    w = w_ref[...]
    b = b_ref[...]
    for i in range(n_batch):  # static, small N
        y = jnp.dot(w, x_ref[i], preferred_element_type=jnp.float32)
        o_ref[i] = (y + b).astype(o_ref.dtype)


def _plan_spatial_tiling(S, N, Cin, Cout, itemsize,
                         vmem_io_budget_bytes=16 * 1024 * 1024):
    """Pick (St, n_tiles, S_pad): lane-aligned tiles sized to a VMEM budget."""
    # Sublane padding: f32 pads channel dims to multiples of 8, bf16 to 16.
    sub = 8 * max(1, 4 // itemsize)
    cin_pad = _round_up(Cin, sub)
    cout_pad = _round_up(Cout, sub)
    # Double-buffered input + output bytes per spatial lane per grid step.
    per_lane = 2 * N * (cin_pad + cout_pad) * itemsize
    st_budget = max(128, (vmem_io_budget_bytes // per_lane) // 128 * 128)

    s128 = _round_up(S, 128)
    n_tiles = max(1, pl.cdiv(s128, st_budget))
    if n_tiles == 1 and s128 >= 256:
        # Keep >= 2 parallel grid steps so both v7x TensorCores get work.
        n_tiles = 2
    St = _round_up(pl.cdiv(S, n_tiles), 128)
    n_tiles = pl.cdiv(S, St)          # re-derive after lane rounding
    S_pad = St * n_tiles
    return St, n_tiles, S_pad


def out_conv(x_ncdhw, weight, bias):
    """Forward pass of OutConv: Conv3d(in, out, kernel_size=1) with bias.

    x_ncdhw: (N, Cin, D, H, W)   (PyTorch NCDHW convention, consumed natively)
    weight:  (Cout, Cin, 1, 1, 1)
    bias:    (Cout,)
    returns: (N, Cout, D, H, W)
    """
    N, Cin, D, H, W = x_ncdhw.shape
    Cout = weight.shape[0]
    S = D * H * W
    dtype = x_ncdhw.dtype
    itemsize = jnp.dtype(dtype).itemsize

    St, n_tiles, S_pad = _plan_spatial_tiling(S, N, Cin, Cout, itemsize)

    x2 = x_ncdhw.reshape(N, Cin, S)            # contiguous reshape, no transpose
    if S_pad != S:
        x2 = jnp.pad(x2, ((0, 0), (0, 0), (0, S_pad - S)))
    w2 = weight.reshape(Cout, Cin).astype(dtype)
    b2 = bias.reshape(Cout, 1).astype(jnp.float32)

    out = pl.pallas_call(
        functools.partial(_outconv_kernel, n_batch=N),
        out_shape=jax.ShapeDtypeStruct((N, Cout, S_pad), dtype),
        grid_spec=pltpu.PrefetchScalarGridSpec(
            num_scalar_prefetch=0,
            grid=(n_tiles,),
            in_specs=[
                pl.BlockSpec((N, Cin, St), lambda s: (0, 0, s)),
                pl.BlockSpec((Cout, Cin), lambda s: (0, 0)),
                pl.BlockSpec((Cout, 1), lambda s: (0, 0)),
            ],
            out_specs=pl.BlockSpec((N, Cout, St), lambda s: (0, 0, s)),
        ),
        compiler_params=pltpu.CompilerParams(
            dimension_semantics=("parallel",),
            vmem_limit_bytes=32 * 1024 * 1024),
    )(x2, w2, b2)

    if S_pad != S:
        out = out[:, :, :S]
    return out.reshape(N, Cout, D, H, W)


def _reference_out_conv(x_ncdhw, weight, bias):
    """Pure-JAX reference (matches PyTorch Conv3d k=1 semantics)."""
    N, Cin, D, H, W = x_ncdhw.shape
    Cout = weight.shape[0]
    x2 = x_ncdhw.reshape(N, Cin, D * H * W)
    w2 = weight.reshape(Cout, Cin)
    y = jnp.einsum("oc,ncs->nos", w2, x2) + bias.reshape(1, Cout, 1)
    return y.reshape(N, Cout, D, H, W)


if __name__ == "__main__":
    key = jax.random.PRNGKey(0)
    kx, kw, kb = jax.random.split(key, 3)

    N, Cin, D, H, W = 2, 4, 16, 16, 16
    Cout = 8
    x = jax.random.normal(kx, (N, Cin, D, H, W), jnp.float32)
    weight = jax.random.normal(kw, (Cout, Cin, 1, 1, 1), jnp.float32)
    weight = weight * (1.0 / Cin) ** 0.5
    bias = 0.1 * jax.random.normal(kb, (Cout,), jnp.float32)

    out = jax.block_until_ready(out_conv(x, weight, bias))
    ref = jax.block_until_ready(_reference_out_conv(x, weight, bias))

    assert out.shape == (N, Cout, D, H, W), out.shape
    np.testing.assert_allclose(np.asarray(out), np.asarray(ref),
                               rtol=1e-4, atol=1e-4)
    print("KERNEL_OK")
</pallas_src>

<mosaic_0001>
module attributes {stable_mosaic.version = 11 : i64} {
  func.func @_outconv_kernel(%arg0: i32, %arg1: memref<2x4x2048xf32, #tpu.memory_space<vmem>>, %arg2: memref<8x4xf32, #tpu.memory_space<vmem>>, %arg3: memref<8x1xf32, #tpu.memory_space<vmem>>, %arg4: memref<2x8x2048xf32, #tpu.memory_space<vmem>>) attributes {dimension_semantics = [#tpu.dimension_semantics<parallel>], iteration_bounds = array<i64: 2>, scalar_prefetch = 0 : i64, scratch_operands = 0 : i64, tpu.core_type = #tpu.core_type<tc>, window_params = [{transform_indices = @transform_0, window_bounds = array<i64: 2, 4, 2048>}, {pipeline_mode = #tpu.pipeline_mode<synchronous>, transform_indices = @transform_1, window_bounds = array<i64: 8, 4>}, {pipeline_mode = #tpu.pipeline_mode<synchronous>, transform_indices = @transform_2, window_bounds = array<i64: 8, 1>}, {transform_indices = @transform_3, window_bounds = array<i64: 2, 8, 2048>}]} {
    %c0 = arith.constant 0 : index
    %c0_0 = arith.constant 0 : index
    %0 = vector.load %arg2[%c0, %c0_0] : memref<8x4xf32, #tpu.memory_space<vmem>>, vector<8x4xf32>
    %c0_1 = arith.constant 0 : index
    %c0_2 = arith.constant 0 : index
    %1 = vector.load %arg3[%c0_1, %c0_2] : memref<8x1xf32, #tpu.memory_space<vmem>>, vector<8x1xf32>
    %c0_3 = arith.constant 0 : index
    %c0_4 = arith.constant 0 : index
    %c0_5 = arith.constant 0 : index
    %2 = vector.load %arg1[%c0_3, %c0_4, %c0_5] : memref<2x4x2048xf32, #tpu.memory_space<vmem>>, vector<1x4x2048xf32>
    %3 = vector.shape_cast %2 : vector<1x4x2048xf32> to vector<4x2048xf32>
    %cst = arith.constant dense<0.000000e+00> : vector<8x2048xf32>
    %4 = tpu.matmul %0, %3, %cst {dimension_numbers = #tpu.dot_dimension_numbers<[1], [0], [0], [1], [0, 0, 1, 1], [], []>} : vector<8x4xf32>, vector<4x2048xf32>, vector<8x2048xf32> -> vector<8x2048xf32>
    %5 = vector.broadcast %1 : vector<8x1xf32> to vector<8x2048xf32>
    %6 = arith.addf %4, %5 : vector<8x2048xf32>
    %c0_6 = arith.constant 0 : index
    %c0_7 = arith.constant 0 : index
    %c0_8 = arith.constant 0 : index
    %7 = vector.load %arg4[%c0_6, %c0_7, %c0_8] : memref<2x8x2048xf32, #tpu.memory_space<vmem>>, vector<1x8x2048xf32>
    %8 = vector.shape_cast %7 : vector<1x8x2048xf32> to vector<8x2048xf32>
    %9 = vector.shape_cast %6 : vector<8x2048xf32> to vector<1x8x2048xf32>
    tpu.vector_store %arg4[%c0_6, %c0_7, %c0_8], %9 {strides = array<i32>} : memref<2x8x2048xf32, #tpu.memory_space<vmem>>, vector<1x8x2048xf32>,
    %c1 = arith.constant 1 : index
    %c0_9 = arith.constant 0 : index
    %c0_10 = arith.constant 0 : index
    %10 = vector.load %arg1[%c1, %c0_9, %c0_10] : memref<2x4x2048xf32, #tpu.memory_space<vmem>>, vector<1x4x2048xf32>
    %11 = vector.shape_cast %10 : vector<1x4x2048xf32> to vector<4x2048xf32>
    %cst_11 = arith.constant dense<0.000000e+00> : vector<8x2048xf32>
    %12 = tpu.matmul %0, %11, %cst_11 {dimension_numbers = #tpu.dot_dimension_numbers<[1], [0], [0], [1], [0, 0, 1, 1], [], []>} : vector<8x4xf32>, vector<4x2048xf32>, vector<8x2048xf32> -> vector<8x2048xf32>
    %13 = vector.broadcast %1 : vector<8x1xf32> to vector<8x2048xf32>
    %14 = arith.addf %12, %13 : vector<8x2048xf32>
    %c1_12 = arith.constant 1 : index
    %c0_13 = arith.constant 0 : index
    %c0_14 = arith.constant 0 : index
    %15 = vector.load %arg4[%c1_12, %c0_13, %c0_14] : memref<2x8x2048xf32, #tpu.memory_space<vmem>>, vector<1x8x2048xf32>
    %16 = vector.shape_cast %15 : vector<1x8x2048xf32> to vector<8x2048xf32>
    %17 = vector.shape_cast %14 : vector<8x2048xf32> to vector<1x8x2048xf32>
    tpu.vector_store %arg4[%c1_12, %c0_13, %c0_14], %17 {strides = array<i32>} : memref<2x8x2048xf32, #tpu.memory_space<vmem>>, vector<1x8x2048xf32>,
    return
  }
  func.func @transform_0(%arg0: i32) -> (i32, i32, i32) {
    %c0_i32 = arith.constant 0 : i32
    %c0_i32_0 = arith.constant 0 : i32
    %c0_i32_1 = arith.constant 0 : i32
    return %c0_i32, %c0_i32_0, %arg0 : i32, i32, i32
  }
  func.func @transform_1(%arg0: i32) -> (i32, i32) {
    %c0_i32 = arith.constant 0 : i32
    %c0_i32_0 = arith.constant 0 : i32
    %c0_i32_1 = arith.constant 0 : i32
    return %c0_i32, %c0_i32_0 : i32, i32
  }
  func.func @transform_2(%arg0: i32) -> (i32, i32) {
    %c0_i32 = arith.constant 0 : i32
    %c0_i32_0 = arith.constant 0 : i32
    %c0_i32_1 = arith.constant 0 : i32
    return %c0_i32, %c0_i32_0 : i32, i32
  }
  func.func @transform_3(%arg0: i32) -> (i32, i32, i32) {
    %c0_i32 = arith.constant 0 : i32
    %c0_i32_0 = arith.constant 0 : i32
    %c0_i32_1 = arith.constant 0 : i32
    return %c0_i32, %c0_i32_0, %arg0 : i32, i32, i32
  }
}

</mosaic_0001>

<bundles_post_ra>
// kernel: tpu_custom_call.1
= control target key start
LH: loop header
LB: loop body
LE: loop exit
PB: predicated region body
PF: predicated region fallthrough
CT: control target
= control target key end

     0   :  { %8 = vsyncpa [#allocation3], 0  ;;  %s2199_s0 = inlined_call_operand.hbm [shape: f32[2,4,4096], index: 0, kind: input, shape index: {}]   ;;  %s2200_s1 = inlined_call_operand.vmem [shape: f32[8,4], index: 1, kind: input, shape index: {}]   ;;  %s2201_s2 = inlined_call_operand.vmem [shape: f32[8,1], index: 2, kind: input, shape index: {}]   ;;  %s2202_s3 = inlined_call_operand.hbm [shape: f32[2,8,4096], index: 3, kind: output, shape index: {}]  }
   0x1   :  { %10 = vsyncpa [#allocation3 + $0x1], 0 }
   0x2   :  { %11 = vsyncpa [#allocation4], 0 }
   0x3   :  { %13 = vsyncpa [#allocation4 + $0x1], 0  ;;  %s1859_s12 = smov 0   ;;  %s1861_s13 = smov 0  }
   0x4   :  { %s1863_s14 = smov 0   ;;  %s1865_s15 = smov 0  }
   0x5 LB: > { %s1880_s16 = sadd.s32 4294967295, %s1827_s15   ;;  %s1572_s17 = sadd.s32 4294967294, %s1827_s15   ;;  %s1827_s15 = sphi %s1865_s15, %s2216_s15   ;;  %s1823_s14 = sphi %s1863_s14, %s2215_s14   ;;  %s1819_s13 = sphi %s1861_s13, %s2214_s13   ;;  %s1815_s12 = sphi %s1859_s12, %s2213_s12  }
   0x6   : > { %s1884_s18 = sadd.s32 1, %s1827_s15   ;;  %s26_s19 = sadd.s32 1, %s1823_s14 }
   0x7   : > { %s23_s20 = ssub.s32 %s1827_s15, %s1884_s18  ;;  %p33_p0 = scmp.ne.s32.totalorder %s1823_s14, %s1819_s13 }
   0x8   : > { %p24_p1 = scmp.eq.s32.totalorder %s23_s20, 0  ;;  %p34_p2 = scmp.eq.s32.totalorder %s1827_s15, 0 }
   0x9   : > { %p39_p3 = scmp.ne.s32.totalorder %s1819_s13, %s1815_s12  ;;  %p40_p4 = scmp.eq.s32.totalorder %s1880_s16, 0 }
   0xa   : > { %s1896_s21 = scalar_select %p24_p1, %s1823_s14, %s26_s19  }
   0xb   : > { %p1898_p5 = por %p34_p2, %p33_p0  ;;  %p1902_p6 = por %p40_p4, %p39_p3 }
   0xc   : > { %p105_p7 = scmp.eq.s32.totalorder %s1880_s16, 1  ;;  %p111_p8 = scmp.eq.s32.totalorder %s1572_s17, 1 }
   0xd   : > { %p1672_p10 = scmp.lt.s32.totalorder %s1827_s15, 2  ;;  %s137_s26 = sand.u32 1, %s1823_s14  }
   0xe   : > { %p1909_p11 = por %p105_p7, %p33_p0  ;;  %p1913_p12 = por %p111_p8, %p39_p3 }
   0xf   : > { %s1658_s27 = sshll.u32 %s1827_s15, 10  ;;  %s1575_s28 = sshll.u32 %s137_s26, 7 }
  0x10   : > { %s2206_s24 = scalar_select %p1909_p11, 1, 0 }
  0x11   : > { %s2207_s25 = scalar_select %p1913_p12, 1, 0 }
  0x12   : > { %s1922_s4 = scalar_lea.hbm %s2199_s0, %s1658_s27  ;;  %s141_s5 = scalar_lea.vmem [#allocation2], %s1575_s28 }
  0x13   : > { %s148_s6 = sshll.u32 %s141_s5, 4  ;;  %p1926_p13 = pnand %p1672_p10, %p1898_p5  ;;  %s1930_s6 = int_to_ptr.vmem [resolvable:$true] %s148_s6 }
  0x14   : > { %s1933_s8 = scalar_lea.sflag [#allocation3], %s137_s26  ;;  %s1731_s9 = scalar_lea.hbm %s1922_s4, 2048 }
  0x15   : > { %p1732_p1 = scmp.ne.s32.totalorder %s1922_s4, %s1731_s9  ;;  %p1733_p2 = pneg %p1926_p13 }
  0x16   : > { %s1736_s17 = scalar_lea.hbm %s2199_s0, 4096  ;;  %p1737_p5 = scmp.lt.u32.totalorder %s1922_s4, %s2199_s0 }
  0x17   : > { %p1734_p3 = pnand %p1733_p2, %p1732_p1  ;;  %p1738_p7 = scmp.lt.u32.totalorder %s1736_s17, %s1731_s9 }
  0x18   : > { %p1740_p10 = scmp.lt.u32.totalorder %s1731_s9, %s1922_s4 }
  0x19   : > { %p1735_p4 = pneg %p1734_p3  ;;  %p1739_p8 = por %p1738_p7, %p1737_p5 }
  0x1b   : > { %p1741_p9 = por %p1740_p10, %p1739_p8 }
  0x1d   : > { %p1742_p0 = pnand %p1741_p9, %p1735_p4 }
  0x1f   : > { %1745 = shalt.err (!%p1742_p0)
}
  0x20   : > { %s1746_s22 = scalar_lea.vmem %s1930_s6, 2048  ;;  %s1829_s26 = smov [#allocation2]  }
  0x21   : > { %p1747_p1 = scmp.ne.s32.totalorder %s1930_s6, %s1746_s22  ;;  %s1751_s27 = sshll.u32 %s1829_s26, 4  ;;  %s1752_s27 = int_to_ptr.vmem [resolvable:$false] %s1751_s27 }
  0x22   : > { %s1753_s28 = scalar_lea.vmem %s1752_s27, 4096  ;;  %p1754_p11 = scmp.lt.s32.totalorder %s1930_s6, %s1752_s27 }
  0x23   : > { %p1749_p3 = pnand %p1747_p1, %p1733_p2  ;;  %p1755_p5 = scmp.lt.s32.totalorder %s1753_s28, %s1746_s22 }
  0x25   : > { %p1750_p12 = pneg %p1749_p3  ;;  %p1756_p7 = por %p1755_p5, %p1754_p11 }
  0x27   : > { %p1757_p8 = pnand %p1756_p7, %p1750_p12 }
  0x29   : > { %1760 = shalt.err (!%p1757_p8)
}
  0x2a   : > { %s1830_s29 = smov 2048   ;;  %s1831_s30 = smov 1024  }
  0x2b   : > { %s1832_s5 = smov 64   ;;  %p156_p9 = scmp.lt.s32.totalorder %s1827_s15, 3 }
  0x2c   : > { %1667 = dma.hbm_to_vmem [thread:$0]  (!%p1926_p13), %s1922_s4, 2048, %s1930_s6, %s1933_s8, %s1830_s29, %s1831_s30, %s1832_s5  }
  0x2d   : > { %p2209_p0 = scmp.ge.s32.totalorder %s1827_s15, 1 }
  0x2f   : > { %p157_p2 = pnand %p2209_p0, %p156_p9 }
  0x30   : > { %s1965_s9 = sand.u32 (!%p157_p2), 1, %s1819_s13  }
  0x31   : > { %160 = sbr.rel (%p157_p2) target bundleno = 321 (0x141), region = 32  ;;  %s1579_s10 = sshll.u32 (!%p157_p2), %s1965_s9, 7 }
  0x32   : > { %s163_s11 = scalar_lea.sflag (!%p157_p2), [#allocation3], %s1965_s9  ;;  %s1969_s17 = scalar_lea.vmem (!%p157_p2), [#allocation2], %s1579_s10 }
  0x38   : > { %1806 = dma.done.wait (%p1902_p6), %s163_s11, 2048  }
  0x39   : > { %1808 = vsyncadd (%p1902_p6), %s163_s11, 4294965248  ;;  %v1833_v0 = vmov 0.0   ;;  %v1834_v1 = vmov 0   ;;  %v193_v2 = vld [vmem:[%s1969_s17] sm:$0xff]  ;;  %vm226_vm0 = vcmask 1043456   ;;  %v194_v3 = vld [vmem:[%s1969_s17 + $0x8] sm:$0xff] }
  0x3a   : > { %323 = vmatprep.mubr.f32.mxu0 %v1833_v0  ;;  %394 = vmatprep.mubr.f32.mxu1 %v1833_v0  ;;  %v214_v4 = vcombine.high %v193_v2, %v193_v2  ;;  %v215_v5 = vcombine.high %v194_v3, %v194_v3  ;;  %v195_v6 = vld [vmem:[%s1969_s17 + $0x10] sm:$0xff]  ;;  %v196_v7 = vld [vmem:[%s1969_s17 + $0x18] sm:$0xff]  ;;  %v1984_v8 = vld [vmem:[%s2200_s1] sm:$0xff]  ;;  %vm222_vm1 = vcmask 31744   ;;  %s1580_s8 = sshll.u32 %s1965_s9, 8  ;;  %s1659_s20 = sshll.u32 %s1880_s16, 11 }
  0x3b   : > { %1714 = vset.pattern.permute.xlu0 %v1834_v1  ;;  %v216_v9 = vcombine.high %v195_v6, %v195_v6  ;;  %v217_v10 = vcombine.high %v196_v7, %v196_v7  ;;  %v197_v11 = vld [vmem:[%s1969_s17 + $0x20] sm:$0xff]  ;;  %v198_v12 = vld [vmem:[%s1969_s17 + $0x28] sm:$0xff]  ;;  %v199_v15 = vld [vmem:[%s1969_s17 + $0x30] sm:$0xff]  ;;  %s2086_s19 = scalar_lea.vmem [#allocation5], %s1580_s8  ;;  %s2145_s16 = scalar_lea.hbm %s2202_s3, %s1659_s20 }
  0x3c   : > { %1581 = vmatprep.subr.msk.mxu0 %vm226_vm0, %v214_v4  ;;  %1584 = vmatprep.subr.msk.mxu1 %vm226_vm0, %v215_v5  ;;  %v218_v13 = vcombine.high %v197_v11, %v197_v11  ;;  %v219_v14 = vcombine.high %v198_v12, %v198_v12  ;;  %v200_v16 = vld [vmem:[%s1969_s17 + $0x38] sm:$0xff]  ;;  %v220_v17 = vcombine.high %v199_v15, %v199_v15  ;;  %v1605_v19 = vld [vmem:[%s1969_s17 + $0x40] sm:$0xff]  ;;  %v1606_v20 = vld [vmem:[%s1969_s17 + $0x48] sm:$0xff]  ;;  %s1499_s22 = sshll.u32 %s2086_s19, 4  ;;  %s1486_s28 = scalar_lea.sflag [#allocation4], %s1965_s9  ;;  %s2149_s22 = int_to_ptr.vmem [resolvable:$true] %s1499_s22 }
  0x3d   : > { %1582 = vmatpush1.msk.msra.mxu0 %vm226_vm0, %v193_v2  ;;  %1585 = vmatpush1.msk.msra.mxu1 %vm226_vm0, %v194_v3  ;;  %v221_v18 = vcombine.high %v200_v16, %v200_v16  ;;  %v860_v21 = vcombine.high %v1605_v19, %v1605_v19  ;;  %v861_v22 = vcombine.high %v1606_v20, %v1606_v20  ;;  %v1607_v23 = vld [vmem:[%s1969_s17 + $0x50] sm:$0xff]  ;;  %v1608_v24 = vld [vmem:[%s1969_s17 + $0x58] sm:$0xff]  ;;  %v1609_v27 = vld [vmem:[%s1969_s17 + $0x60] sm:$0xff]  ;;  %s1761_s29 = scalar_lea.vmem %s2149_s22, 4096  ;;  %p2210_p11 = scmp.ne.s32.totalorder %s2206_s24, 0 }
  0x3e   : > { %1583 = vmatmul.mubr.msk.f32.vlgmr.msra.gmra.mrb[0].mxu0 %vm222_vm1, %v1984_v8  ;;  %1586 = vmatmul.mubr.msk.f32.vlgmr.msra.gmra.mrb[0].mxu1 %vm222_vm1, %v1984_v8  ;;  %v862_v25 = vcombine.high %v1607_v23, %v1607_v23  ;;  %v863_v26 = vcombine.high %v1608_v24, %v1608_v24  ;;  %v1610_v28 = vld [vmem:[%s1969_s17 + $0x68] sm:$0xff]  ;;  %v864_v29 = vcombine.high %v1609_v27, %v1609_v27  ;;  %v1611_v31 = vld [vmem:[%s1969_s17 + $0x70] sm:$0xff]  ;;  %v1612_v32 = vld [vmem:[%s1969_s17 + $0x78] sm:$0xff]  ;;  %p1762_p6 = scmp.ne.s32.totalorder %s2149_s22, %s1761_s29  ;;  %s1835_s30 = smov [#allocation5]  }
  0x3f   : > { %1587 = vmatprep.subr.msk.mxu0 %vm226_vm0, %v216_v9  ;;  %1590 = vmatprep.subr.msk.mxu1 %vm226_vm0, %v217_v10  ;;  %v865_v30 = vcombine.high %v1610_v28, %v1610_v28  ;;  %v866_v33 = vcombine.high %v1611_v31, %v1611_v31  ;;  %v867_v34 = vcombine.high %v1612_v32, %v1612_v32  ;;  %v192_v35 = vld [vmem:[%s2201_s2] sm:$0xff]  ;;  %s1765_s5 = sshll.u32 %s1835_s30, 4  ;;  %s1766_s5 = int_to_ptr.vmem [resolvable:$false] %s1765_s5 }
  0x40   : > { %1588 = vmatpush1.msk.msra.mxu0 %vm226_vm0, %v195_v6  ;;  %1591 = vmatpush1.msk.msra.mxu1 %vm226_vm0, %v196_v7  ;;  %p1763_p12 = pnand %p1762_p6, %p2210_p11  ;;  %s1767_s10 = scalar_lea.vmem %s1766_s5, 8192 }
  0x41   : > { %465 = vmatprep.mubr.f32.mxu0 %v1833_v0  ;;  %536 = vmatprep.mubr.f32.mxu1 %v1833_v0  ;;  %p1768_p4 = scmp.lt.s32.totalorder %s2149_s22, %s1766_s5  ;;  %p1769_p10 = scmp.lt.s32.totalorder %s1767_s10, %s1761_s29 }
  0x42   : > { %1589 = vmatmul.mubr.msk.f32.vlgmr.msra.gmra.mrb[2].mxu0 %vm222_vm1, %v1984_v8  ;;  %1592 = vmatmul.mubr.msk.f32.vlgmr.msra.gmra.mrb[2].mxu1 %vm222_vm1, %v1984_v8  ;;  %p1764_p13 = pneg %p1763_p12 }
  0x43   : > { %1593 = vmatprep.subr.msk.mxu0 %vm226_vm0, %v218_v13  ;;  %1596 = vmatprep.subr.msk.mxu1 %vm226_vm0, %v219_v14  ;;  %p1770_p1 = por %p1769_p10, %p1768_p4 }
  0x44   : > { %1594 = vmatpush1.msk.msra.mxu0 %vm226_vm0, %v197_v11  ;;  %1597 = vmatpush1.msk.msra.mxu1 %vm226_vm0, %v198_v12 }
  0x45   : > { %607 = vmatprep.mubr.f32.mxu0 %v1833_v0  ;;  %678 = vmatprep.mubr.f32.mxu1 %v1833_v0  ;;  %p1771_p3 = pnand %p1770_p1, %p1764_p13 }
  0x46   : > { %1595 = vmatmul.mubr.msk.f32.vlgmr.msra.gmra.mrb[4].mxu0 %vm222_vm1, %v1984_v8  ;;  %1598 = vmatmul.mubr.msk.f32.vlgmr.msra.gmra.mrb[4].mxu1 %vm222_vm1, %v1984_v8 }
  0x47   : > { %1599 = vmatprep.subr.msk.mxu0 %vm226_vm0, %v220_v17  ;;  %1602 = vmatprep.subr.msk.mxu1 %vm226_vm0, %v221_v18 }
  0x48   : > { %1600 = vmatpush1.msk.msra.mxu0 %vm226_vm0, %v199_v15  ;;  %1603 = vmatpush1.msk.msra.mxu1 %vm226_vm0, %v200_v16 }
  0x49   : > { %749 = vmatprep.mubr.f32.mxu0 %v1833_v0  ;;  %820 = vmatprep.mubr.f32.mxu1 %v1833_v0 }
  0x4a   : > { %1601 = vmatmul.mubr.msk.f32.vlgmr.msra.gmra.mrb[6].mxu0 %vm222_vm1, %v1984_v8  ;;  %1604 = vmatmul.mubr.msk.f32.vlgmr.msra.gmra.mrb[6].mxu1 %vm222_vm1, %v1984_v8 }
  0x4b   : > { %1613 = vmatprep.subr.msk.mxu0 %vm226_vm0, %v860_v21  ;;  %1616 = vmatprep.subr.msk.mxu1 %vm226_vm0, %v861_v22 }
  0x4c   : > { %1614 = vmatpush1.msk.msra.mxu0 %vm226_vm0, %v1605_v19  ;;  %1617 = vmatpush1.msk.msra.mxu1 %vm226_vm0, %v1606_v20 }
  0x4d   : > { %964 = vmatprep.mubr.f32.mxu0 %v1833_v0  ;;  %1035 = vmatprep.mubr.f32.mxu1 %v1833_v0 }
  0x4e   : > { %1615 = vmatmul.mubr.msk.f32.vlgmr.msra.gmra.mrb[8].mxu0 %vm222_vm1, %v1984_v8  ;;  %1618 = vmatmul.mubr.msk.f32.vlgmr.msra.gmra.mrb[8].mxu1 %vm222_vm1, %v1984_v8 }
  0x4f   : > { %1619 = vmatprep.subr.msk.mxu0 %vm226_vm0, %v862_v25  ;;  %1622 = vmatprep.subr.msk.mxu1 %vm226_vm0, %v863_v26 }
  0x50   : > { %1620 = vmatpush1.msk.msra.mxu0 %vm226_vm0, %v1607_v23  ;;  %1623 = vmatpush1.msk.msra.mxu1 %vm226_vm0, %v1608_v24 }
  0x51   : > { %1106 = vmatprep.mubr.f32.mxu0 %v1833_v0  ;;  %1177 = vmatprep.mubr.f32.mxu1 %v1833_v0 }
  0x52   : > { %1621 = vmatmul.mubr.msk.f32.vlgmr.msra.gmra.mrb[10].mxu0 %vm222_vm1, %v1984_v8  ;;  %1624 = vmatmul.mubr.msk.f32.vlgmr.msra.gmra.mrb[10].mxu1 %vm222_vm1, %v1984_v8 }
  0x53   : > { %1625 = vmatprep.subr.msk.mxu0 %vm226_vm0, %v864_v29  ;;  %1628 = vmatprep.subr.msk.mxu1 %vm226_vm0, %v865_v30 }
  0x54   : > { %1626 = vmatpush1.msk.msra.mxu0 %vm226_vm0, %v1609_v27  ;;  %1629 = vmatpush1.msk.msra.mxu1 %vm226_vm0, %v1610_v28 }
  0x55   : > { %1248 = vmatprep.mubr.f32.mxu0 %v1833_v0  ;;  %1319 = vmatprep.mubr.f32.mxu1 %v1833_v0 }
  0x56   : > { %1627 = vmatmul.mubr.msk.f32.vlgmr.msra.gmra.mrb[12].mxu0 %vm222_vm1, %v1984_v8  ;;  %1630 = vmatmul.mubr.msk.f32.vlgmr.msra.gmra.mrb[12].mxu1 %vm222_vm1, %v1984_v8 }
  0x57   : > { %1631 = vmatprep.subr.msk.mxu0 %vm226_vm0, %v866_v33  ;;  %1634 = vmatprep.subr.msk.mxu1 %vm226_vm0, %v867_v34 }
  0x58   : > { %1632 = vmatpush1.msk.msra.mxu0 %vm226_vm0, %v1611_v31  ;;  %1635 = vmatpush1.msk.msra.mxu1 %vm226_vm0, %v1612_v32 }
  0x59   : > { %1390 = vmatprep.mubr.f32.mxu0 %v1833_v0  ;;  %1461 = vmatprep.mubr.f32.mxu1 %v1833_v0 }
  0x5a   : > { %1633 = vmatmul.mubr.msk.f32.vlgmr.msra.gmra.mrb[14].mxu0 %vm222_vm1, %v1984_v8  ;;  %1636 = vmatmul.mubr.msk.f32.vlgmr.msra.gmra.mrb[14].mxu1 %vm222_vm1, %v1984_v8 }
  0x5b   : > { %203 = vperm.xlu0 %1714, %v192_v35  }
  0xda   : > { %v2080_v36 = vpop.permute.xlu0 %203 }
 0x111   : > { %v325_v37 = vpop.f32.mrb[0].mxu0  ;;  %v396_v38 = vpop.f32.mrb[0].mxu1 }
 0x112   : > { %v326_v39 = vadd.f32 %v325_v37, %v2080_v36  ;;  %v397_v40 = vadd.f32 %v396_v38, %v2080_v36  ;;  %v327_v41 = vpop.f32.mrb[1].mxu0  ;;  %v398_v42 = vpop.f32.mrb[1].mxu1 }
 0x113   : > { %v328_v43 = vadd.f32 %v327_v41, %v2080_v36  ;;  %v399_v44 = vadd.f32 %v398_v42, %v2080_v36 }
 0x114   : > { %827 = vst [vmem:[%s2086_s19] sm:$0xff] %v326_v39  ;;  %829 = vst [vmem:[%s2086_s19 + $0x10] sm:$0xff] %v397_v40 }
 0x115   : > { %828 = vst [vmem:[%s2086_s19 + $0x8] sm:$0xff] %v328_v43  ;;  %830 = vst [vmem:[%s2086_s19 + $0x18] sm:$0xff] %v399_v44  ;;  %v467_v45 = vpop.f32.mrb[2].mxu0  ;;  %v538_v46 = vpop.f32.mrb[2].mxu1 }
 0x116   : > { %v468_v47 = vadd.f32 %v467_v45, %v2080_v36  ;;  %v539_v48 = vadd.f32 %v538_v46, %v2080_v36  ;;  %v469_v49 = vpop.f32.mrb[3].mxu0  ;;  %v540_v50 = vpop.f32.mrb[3].mxu1 }
 0x117   : > { %v470_v51 = vadd.f32 %v469_v49, %v2080_v36  ;;  %v541_v52 = vadd.f32 %v540_v50, %v2080_v36 }
 0x118   : > { %831 = vst [vmem:[%s2086_s19 + $0x20] sm:$0xff] %v468_v47  ;;  %833 = vst [vmem:[%s2086_s19 + $0x30] sm:$0xff] %v539_v48 }
 0x119   : > { %832 = vst [vmem:[%s2086_s19 + $0x28] sm:$0xff] %v470_v51  ;;  %834 = vst [vmem:[%s2086_s19 + $0x38] sm:$0xff] %v541_v52  ;;  %v609_v53 = vpop.f32.mrb[4].mxu0  ;;  %v680_v54 = vpop.f32.mrb[4].mxu1 }
 0x11a   : > { %v610_v55 = vadd.f32 %v609_v53, %v2080_v36  ;;  %v681_v56 = vadd.f32 %v680_v54, %v2080_v36  ;;  %v611_v57 = vpop.f32.mrb[5].mxu0  ;;  %v682_v58 = vpop.f32.mrb[5].mxu1 }
 0x11b   : > { %v612_v59 = vadd.f32 %v611_v57, %v2080_v36  ;;  %v683_v60 = vadd.f32 %v682_v58, %v2080_v36 }
 0x11c   : > { %835 = vst [vmem:[%s2086_s19 + $0x40] sm:$0xff] %v610_v55  ;;  %837 = vst [vmem:[%s2086_s19 + $0x50] sm:$0xff] %v681_v56 }
 0x11d   : > { %836 = vst [vmem:[%s2086_s19 + $0x48] sm:$0xff] %v612_v59  ;;  %838 = vst [vmem:[%s2086_s19 + $0x58] sm:$0xff] %v683_v60  ;;  %v751_v61 = vpop.f32.mrb[6].mxu0  ;;  %v822_v62 = vpop.f32.mrb[6].mxu1 }
 0x11e   : > { %v752_v63 = vadd.f32 %v751_v61, %v2080_v36  ;;  %v823_v0 = vadd.f32 %v822_v62, %v2080_v36  ;;  %v753_v1 = vpop.f32.mrb[7].mxu0  ;;  %v824_v2 = vpop.f32.mrb[7].mxu1 }
 0x11f   : > { %v754_v3 = vadd.f32 %v753_v1, %v2080_v36  ;;  %v825_v4 = vadd.f32 %v824_v2, %v2080_v36 }
 0x120   : > { %839 = vst [vmem:[%s2086_s19 + $0x60] sm:$0xff] %v752_v63  ;;  %841 = vst [vmem:[%s2086_s19 + $0x70] sm:$0xff] %v823_v0 }
 0x121   : > { %840 = vst [vmem:[%s2086_s19 + $0x68] sm:$0xff] %v754_v3  ;;  %842 = vst [vmem:[%s2086_s19 + $0x78] sm:$0xff] %v825_v4  ;;  %v966_v5 = vpop.f32.mrb[8].mxu0  ;;  %v1037_v6 = vpop.f32.mrb[8].mxu1 }
 0x122   : > { %v967_v7 = vadd.f32 %v966_v5, %v2080_v36  ;;  %v1038_v8 = vadd.f32 %v1037_v6, %v2080_v36  ;;  %v968_v9 = vpop.f32.mrb[9].mxu0  ;;  %v1039_v10 = vpop.f32.mrb[9].mxu1 }
 0x123   : > { %v969_v11 = vadd.f32 %v968_v9, %v2080_v36  ;;  %v1040_v12 = vadd.f32 %v1039_v10, %v2080_v36 }
 0x124   : > { %1637 = vst [vmem:[%s2086_s19 + $0x80] sm:$0xff] %v967_v7  ;;  %1639 = vst [vmem:[%s2086_s19 + $0x90] sm:$0xff] %v1038_v8 }
 0x125   : > { %1638 = vst [vmem:[%s2086_s19 + $0x88] sm:$0xff] %v969_v11  ;;  %1640 = vst [vmem:[%s2086_s19 + $0x98] sm:$0xff] %v1040_v12  ;;  %v1108_v13 = vpop.f32.mrb[10].mxu0  ;;  %v1179_v14 = vpop.f32.mrb[10].mxu1 }
 0x126   : > { %v1109_v15 = vadd.f32 %v1108_v13, %v2080_v36  ;;  %v1180_v16 = vadd.f32 %v1179_v14, %v2080_v36  ;;  %v1110_v17 = vpop.f32.mrb[11].mxu0  ;;  %v1181_v18 = vpop.f32.mrb[11].mxu1 }
 0x127   : > { %v1111_v19 = vadd.f32 %v1110_v17, %v2080_v36  ;;  %v1182_v20 = vadd.f32 %v1181_v18, %v2080_v36 }
 0x128   : > { %1641 = vst [vmem:[%s2086_s19 + $0xa0] sm:$0xff] %v1109_v15  ;;  %1643 = vst [vmem:[%s2086_s19 + $0xb0] sm:$0xff] %v1180_v16 }
 0x129   : > { %1642 = vst [vmem:[%s2086_s19 + $0xa8] sm:$0xff] %v1111_v19  ;;  %1644 = vst [vmem:[%s2086_s19 + $0xb8] sm:$0xff] %v1182_v20  ;;  %v1250_v21 = vpop.f32.mrb[12].mxu0  ;;  %v1321_v22 = vpop.f32.mrb[12].mxu1 }
 0x12a   : > { %v1251_v23 = vadd.f32 %v1250_v21, %v2080_v36  ;;  %v1322_v24 = vadd.f32 %v1321_v22, %v2080_v36  ;;  %v1252_v25 = vpop.f32.mrb[13].mxu0  ;;  %v1323_v26 = vpop.f32.mrb[13].mxu1 }
 0x12b   : > { %v1253_v27 = vadd.f32 %v1252_v25, %v2080_v36  ;;  %v1324_v28 = vadd.f32 %v1323_v26, %v2080_v36 }
 0x12c   : > { %1645 = vst [vmem:[%s2086_s19 + $0xc0] sm:$0xff] %v1251_v23  ;;  %1647 = vst [vmem:[%s2086_s19 + $0xd0] sm:$0xff] %v1322_v24 }
 0x12d   : > { %1646 = vst [vmem:[%s2086_s19 + $0xc8] sm:$0xff] %v1253_v27  ;;  %1648 = vst [vmem:[%s2086_s19 + $0xd8] sm:$0xff] %v1324_v28  ;;  %v1392_v29 = vpop.f32.mrb[14].mxu0  ;;  %v1463_v30 = vpop.f32.mrb[14].mxu1 }
 0x12e   : > { %v1393_v31 = vadd.f32 %v1392_v29, %v2080_v36  ;;  %v1464_v32 = vadd.f32 %v1463_v30, %v2080_v36  ;;  %v1394_v33 = vpop.f32.mrb[15].mxu0  ;;  %v1465_v34 = vpop.f32.mrb[15].mxu1 }
 0x12f   : > { %v1395_v35 = vadd.f32 %v1394_v33, %v2080_v36  ;;  %v1466_v37 = vadd.f32 %v1465_v34, %v2080_v36 }
 0x130   : > { %1649 = vst [vmem:[%s2086_s19 + $0xe0] sm:$0xff] %v1393_v31  ;;  %1651 = vst [vmem:[%s2086_s19 + $0xf0] sm:$0xff] %v1464_v32 }
 0x131   : > { %1650 = vst [vmem:[%s2086_s19 + $0xe8] sm:$0xff] %v1395_v35  ;;  %1652 = vst [vmem:[%s2086_s19 + $0xf8] sm:$0xff] %v1466_v37 }
 0x132   : > { %1774 = shalt.err (!%p1771_p3)
}
 0x133   : > { %s1775_s11 = scalar_lea.hbm %s2145_s16, 4096  ;;  %s1779_s4 = scalar_lea.hbm %s2202_s3, 8192 }
 0x134   : > { %p1776_p5 = scmp.ne.s32.totalorder %s2145_s16, %s1775_s11  ;;  %p1780_p9 = scmp.lt.u32.totalorder %s2145_s16, %s2202_s3 }
 0x135   : > { %p1781_p0 = scmp.lt.u32.totalorder %s1779_s4, %s1775_s11  ;;  %p1783_p6 = scmp.lt.u32.totalorder %s1775_s11, %s2145_s16 }
 0x136   : > { %p1777_p7 = pnand %p1776_p5, %p2210_p11 }
 0x137   : > { %p1782_p2 = por %p1781_p0, %p1780_p9 }
 0x138   : > { %p1778_p8 = pneg %p1777_p7 }
 0x139   : > { %p1784_p12 = por %p1783_p6, %p1782_p2 }
 0x13b   : > { %p1785_p13 = pnand %p1784_p12, %p1778_p8 }
 0x13d   : > { %1788 = shalt.err (!%p1785_p13)
}
 0x13e   : > { %s1836_s8 = smov 2048   ;;  %s1837_s19 = smov 4096  }
 0x13f   : > { %s1838_s20 = smov 128  }
 0x140   : > { %1662 = dma.vmem_to_hbm [thread:$0]  (%p2210_p11), %s2149_s22, 4096, %s2145_s16, %s1486_s28, %s1836_s8, %s1837_s19, %s1838_s20  }
 0x141 PF: > { %s1514_s26 = sand.u32 1, %s1815_s12   ;;  %p2211_p4 = scmp.ne.s32.totalorder %s2207_s25, 0 }
 0x142   : > { %p2212_p10 = scmp.ge.s32.totalorder %s1827_s15, 2  ;;  %s1515_s27 = scalar_lea.sflag [#allocation4], %s1514_s26 }
 0x144   : > { %p1669_p1 = pnand %p2212_p10, %p2211_p4 }
 0x146   : > { %1810 = dma.done.wait (!%p1669_p1), %s1515_s27, 4096  }
 0x147   : > { %1812 = vsyncadd (!%p1669_p1), %s1515_s27, 4294963200  ;;  %p16_p3 = scmp.ge.s32.totalorder %s1884_s18, 4   ;;  %s2213_s12 = smov %s1819_s13 }
 0x148   : > { %s2214_s13 = smov %s1823_s14  ;;  %s2215_s14 = smov %s1896_s21 }
 0x149   : > { %s2216_s15 = smov %s1884_s18  ;;  %18 = sbr.rel (!%p16_p3) target bundleno = 5 (0x5), region = 79 }
 0x150   :  { %1520 = vsyncpa [#allocation3], 1 }
 0x151   :  { %1522 = vsyncpa [#allocation3 + $0x1], 1 }
 0x152   :  { %1523 = vsyncpa [#allocation4], 1 }
 0x153   :  { %1525 = vsyncpa [#allocation4 + $0x1], 1 }

</bundles_post_ra>
